<compile_context>
chip_gen: v6e
topology: v6e:2x2x1
jax: 0.10.0
libtpu: 0.0.40
codegen_flags: <defaults>
</compile_context>

<pallas_src>
import functools
import math

import jax
import jax.numpy as jnp
from jax.experimental import pallas as pl
from jax.experimental.pallas import tpu as pltpu

LANES = 128
TARGET_BLOCK_BYTES = 4 * 1024 * 1024     # ~4 MiB per buffer
VMEM_LIMIT_BYTES = 32 * 1024 * 1024      # explicit scoped-VMEM budget (ok on v5e/v6e/v7x)
MIN_PIPELINE_BLOCKS = 4                  # keep >=4 grid steps so the pipeline overlaps


def _round_up(x, m):
    return (x + m - 1) // m * m


def _sublanes_for(dtype):
    # Native sublane packing: 8 rows for 4-byte, 16 for 2-byte, 32 for 1-byte dtypes.
    itemsize = jnp.dtype(dtype).itemsize
    return max(8, 32 // itemsize)


def _prng_noise_kernel(seed_ref, x_ref, o_ref, *, sigma):
    # Fold the user seed with the block id so blocks / user seeds never alias.
    pltpu.prng_seed(seed_ref[0], pl.program_id(0))
    x = x_ref[...]                                    # native dtype (bf16 stays bf16)
    # Box-Muller in f32 (safe on v5e: no bf16 EUP); cast the scale once so the
    # final multiply runs at the input's width.
    noise = pltpu.stateful_normal(x.shape, jnp.float32)
    scale = (1.0 + sigma * noise).astype(x.dtype)
    # forward: x + N(0,1) * (sigma * x)  ==  x * (1 + sigma * N(0,1))
    o_ref[...] = x * scale


def _precomputed_noise_kernel(x_ref, n_ref, o_ref, *, sigma):
    x = x_ref[...]
    scale = (1.0 + sigma * n_ref[...]).astype(x.dtype)
    o_ref[...] = x * scale


def gaussian_noise(x, seed, *, sigma=0.1, is_relative_detach=True, training=True):
    """Pallas TPU implementation of GaussianNoise.forward.

    Returns x unchanged in eval mode or when sigma == 0 (matches PyTorch).
    NOTE: unlike torch's global RNG, the same `seed` reproduces the same noise;
    callers must vary it per invocation / layer / step.
    """
    if not training or sigma == 0:
        return x

    orig_shape = x.shape
    orig_dtype = x.dtype
    itemsize = jnp.dtype(orig_dtype).itemsize
    n = int(math.prod(orig_shape))
    sublanes = _sublanes_for(orig_dtype)

    # Lane-dense (rows, 128) slab.  Pad only to a multiple of LANES when needed.
    if n % LANES == 0:
        rows = n // LANES
        x2d = x.reshape(rows, LANES)
        padded = False
    else:
        # TODO(synk): lane-unaligned tails still cost a pad + slice HBM round
        # trip; in-kernel tail masking via manual DMA would remove it.
        padded_n = _round_up(n, LANES)
        rows = padded_n // LANES
        x2d = jnp.pad(x.reshape(-1), (0, padded_n - n)).reshape(rows, LANES)
        padded = True

    # Block-size selection: big blocks for large tensors, but always >=
    # MIN_PIPELINE_BLOCKS grid steps for mid-size tensors so DMA-in / compute /
    # DMA-out overlap (grid=(1,) fully serializes them).
    tile_r_max = max(sublanes,
                     (TARGET_BLOCK_BYTES // (LANES * itemsize)) // sublanes * sublanes)
    if rows <= sublanes:
        tile_r = rows                                       # tiny tensor: one full block
    elif rows <= tile_r_max:
        tile_r = min(_round_up(pl.cdiv(rows, MIN_PIPELINE_BLOCKS), sublanes),
                     tile_r_max)
    else:
        tile_r = tile_r_max
    grid = (pl.cdiv(rows, tile_r),)                         # ragged last block is masked

    cost = pl.CostEstimate(flops=3 * n, transcendentals=2 * n,
                           bytes_accessed=2 * n * itemsize)

    if jax.default_backend() == "tpu":
        seed_arr = jnp.asarray([seed], dtype=jnp.int32)
        out2d = pl.pallas_call(
            functools.partial(_prng_noise_kernel, sigma=float(sigma)),
            out_shape=jax.ShapeDtypeStruct((rows, LANES), orig_dtype),
            grid_spec=pltpu.PrefetchScalarGridSpec(
                num_scalar_prefetch=1,
                grid=grid,
                in_specs=[pl.BlockSpec((tile_r, LANES), lambda i, seed: (i, 0))],
                out_specs=pl.BlockSpec((tile_r, LANES), lambda i, seed: (i, 0)),
            ),
            # x2d is operand 1 (operand 0 is the prefetched seed): reuse its
            # HBM buffer for the output when the caller donates x.
            input_output_aliases={1: 0},
            compiler_params=pltpu.CompilerParams(
                dimension_semantics=("parallel",),
                has_side_effects=True,          # hardware PRNG state
                vmem_limit_bytes=VMEM_LIMIT_BYTES,
            ),
            cost_estimate=cost,
        )(seed_arr, x2d)
    else:
        # Portable fallback (CPU / interpret): TPU PRNG primitives have no CPU
        # lowering, so draw the noise with jax.random and fuse the rest in Pallas.
        noise2d = jax.random.normal(jax.random.PRNGKey(seed), (rows, LANES),
                                    dtype=jnp.float32)
        out2d = pl.pallas_call(
            functools.partial(_precomputed_noise_kernel, sigma=float(sigma)),
            out_shape=jax.ShapeDtypeStruct((rows, LANES), orig_dtype),
            grid=grid,
            in_specs=[pl.BlockSpec((tile_r, LANES), lambda i: (i, 0)),
                      pl.BlockSpec((tile_r, LANES), lambda i: (i, 0))],
            out_specs=pl.BlockSpec((tile_r, LANES), lambda i: (i, 0)),
            cost_estimate=cost,
        )(x2d, noise2d)

    if padded:
        return out2d.reshape(-1)[:n].reshape(orig_shape)
    return out2d.reshape(orig_shape)


if __name__ == "__main__":
    key = jax.random.PRNGKey(0)
    # NCHW input, small shapes: batch=2, channels=4, spatial=16x16 (n=2048, lane-aligned).
    x = jax.random.normal(key, (2, 4, 16, 16), dtype=jnp.float32)

    y = gaussian_noise(x, seed=1234, sigma=0.1, is_relative_detach=True,
                       training=True)
    y = jax.block_until_ready(y)

    # Sanity checks: shape/dtype preserved, relative perturbation ~sigma-scaled
    # and nonzero, exact pass-through in eval mode.
    assert y.shape == x.shape and y.dtype == x.dtype
    rel = jnp.abs(y - x) / jnp.maximum(jnp.abs(x), 1e-6)
    assert float(jnp.max(rel)) < 1.5
    assert float(jnp.max(jnp.abs(y - x))) > 0

    y_eval = gaussian_noise(x, seed=1234, sigma=0.1, training=False)
    assert bool(jnp.all(y_eval == x))

    # Lane-unaligned shape exercises the (lighter) pad path.
    x2 = jax.random.normal(jax.random.PRNGKey(1), (3, 5, 7), dtype=jnp.float32)
    y2 = jax.block_until_ready(gaussian_noise(x2, seed=7, sigma=0.2))
    assert y2.shape == x2.shape and y2.dtype == x2.dtype
    assert bool(jnp.all(jnp.isfinite(y2)))
    assert float(jnp.max(jnp.abs(y2 - x2))) > 0

    print("KERNEL_OK")
</pallas_src>

<mosaic_0001>
module attributes {stable_mosaic.version = 11 : i64} {
  func.func @_precomputed_noise_kernel(%arg0: i32, %arg1: memref<8x128xf32, #tpu.memory_space<vmem>>, %arg2: memref<8x128xf32, #tpu.memory_space<vmem>>, %arg3: memref<8x128xf32, #tpu.memory_space<vmem>>) attributes {dimension_semantics = [#tpu.dimension_semantics<arbitrary>], iteration_bounds = array<i64: 2>, scalar_prefetch = 0 : i64, scratch_operands = 0 : i64, tpu.core_type = #tpu.core_type<tc>, window_params = [{transform_indices = @transform_0, window_bounds = array<i64: 8, 128>}, {transform_indices = @transform_1, window_bounds = array<i64: 8, 128>}, {transform_indices = @transform_2, window_bounds = array<i64: 8, 128>}]} {
    %c0 = arith.constant 0 : index
    %c0_0 = arith.constant 0 : index
    %0 = vector.load %arg1[%c0, %c0_0] : memref<8x128xf32, #tpu.memory_space<vmem>>, vector<8x128xf32>
    %c0_1 = arith.constant 0 : index
    %c0_2 = arith.constant 0 : index
    %1 = vector.load %arg2[%c0_1, %c0_2] : memref<8x128xf32, #tpu.memory_space<vmem>>, vector<8x128xf32>
    %cst = arith.constant 1.000000e-01 : f32
    %2 = vector.broadcast %cst : f32 to vector<8x128xf32>
    %3 = arith.mulf %2, %1 : vector<8x128xf32>
    %cst_3 = arith.constant 1.000000e+00 : f32
    %4 = vector.broadcast %cst_3 : f32 to vector<8x128xf32>
    %5 = arith.addf %4, %3 : vector<8x128xf32>
    %6 = arith.mulf %0, %5 : vector<8x128xf32>
    %c0_4 = arith.constant 0 : index
    %c0_5 = arith.constant 0 : index
    %7 = vector.load %arg3[%c0_4, %c0_5] : memref<8x128xf32, #tpu.memory_space<vmem>>, vector<8x128xf32>
    tpu.vector_store %arg3[%c0_4, %c0_5], %6 {strides = array<i32>} : memref<8x128xf32, #tpu.memory_space<vmem>>, vector<8x128xf32>,
    return
  }
  func.func @transform_0(%arg0: i32) -> (i32, i32) {
    %c0_i32 = arith.constant 0 : i32
    %c0_i32_0 = arith.constant 0 : i32
    return %arg0, %c0_i32 : i32, i32
  }
  func.func @transform_1(%arg0: i32) -> (i32, i32) {
    %c0_i32 = arith.constant 0 : i32
    %c0_i32_0 = arith.constant 0 : i32
    return %arg0, %c0_i32 : i32, i32
  }
  func.func @transform_2(%arg0: i32) -> (i32, i32) {
    %c0_i32 = arith.constant 0 : i32
    %c0_i32_0 = arith.constant 0 : i32
    return %arg0, %c0_i32 : i32, i32
  }
}

</mosaic_0001>

<bundles_post_ra>
// kernel: tpu_custom_call.1
= control target key start
LH: loop header
LB: loop body
LE: loop exit
PB: predicated region body
PF: predicated region fallthrough
CT: control target
= control target key end

     0   :  { %7 = vsyncpa [#allocation3], 0  ;;  %s713_s0 = inlined_call_operand.hbm [shape: f32[16,128], index: 0, kind: input, shape index: {}]   ;;  %s714_s1 = inlined_call_operand.hbm [shape: f32[16,128], index: 1, kind: input, shape index: {}]   ;;  %s715_s2 = inlined_call_operand.hbm [shape: f32[16,128], index: 2, kind: output, shape index: {}]  }
   0x1   :  { %9 = vsyncpa [#allocation3 + $0x1], 0 }
   0x2   :  { %10 = vsyncpa [#allocation6], 0 }
   0x3   :  { %12 = vsyncpa [#allocation6 + $0x1], 0 }
   0x4   :  { %13 = vsyncpa [#allocation4], 0 }
   0x5   :  { %15 = vsyncpa [#allocation4 + $0x1], 0  ;;  %s519_s9 = smov 0   ;;  %s521_s10 = smov 0  }
   0x6   :  { %s523_s11 = smov 0   ;;  %s525_s12 = smov 0  }
   0x7 LB: > { %s540_s13 = sadd.s32 4294967295, %s499_s12   ;;  %s309_s14 = sadd.s32 4294967294, %s499_s12   ;;  %s499_s12 = sphi %s525_s12, %s734_s12   ;;  %s495_s11 = sphi %s523_s11, %s733_s11   ;;  %s491_s10 = sphi %s521_s10, %s732_s10   ;;  %s487_s9 = sphi %s519_s9, %s731_s9  }
   0x8   : > { %s544_s15 = sadd.s32 1, %s499_s12   ;;  %s28_s16 = sadd.s32 1, %s495_s11 }
   0x9   : > { %s25_s17 = ssub.s32 %s499_s12, %s544_s15  ;;  %p35_p0 = scmp.ne.s32.totalorder %s495_s11, %s491_s10 }
   0xa   : > { %p26_p1 = scmp.eq.s32.totalorder %s25_s17, 0  ;;  %p36_p2 = scmp.eq.s32.totalorder %s499_s12, 0 }
   0xb   : > { %p41_p3 = scmp.ne.s32.totalorder %s491_s10, %s487_s9  ;;  %p42_p4 = scmp.eq.s32.totalorder %s540_s13, 0 }
   0xc   : > { %s556_s18 = scalar_select %p26_p1, %s495_s11, %s28_s16  }
   0xd   : > { %p558_p5 = por %p36_p2, %p35_p0  ;;  %p562_p6 = por %p42_p4, %p41_p3 }
   0xe   : > { %p91_p7 = scmp.eq.s32.totalorder %s540_s13, 1  ;;  %p97_p8 = scmp.eq.s32.totalorder %s309_s14, 1 }
   0xf   : > { %s719_s20 = scalar_select %p562_p6, 1, 0 }
  0x10   : > { %p341_p10 = scmp.lt.s32.totalorder %s499_s12, 2  ;;  %p569_p11 = por %p91_p7, %p35_p0 }
  0x11   : > { %p573_p12 = por %p97_p8, %p41_p3  ;;  %s578_s23 = sand.u32 1, %s495_s11  }
  0x12   : > { %s720_s21 = scalar_select %p569_p11, 1, 0 }
  0x13   : > { %s721_s22 = scalar_select %p573_p12, 1, 0 }
  0x14   : > { %s313_s24 = sshll.u32 %s499_s12, 7  ;;  %s312_s25 = sshll.u32 %s578_s23, 3 }
  0x15   : > { %s587_s28 = scalar_lea.hbm %s713_s0, %s313_s24  ;;  %s121_s29 = scalar_lea.vmem [#allocation2], %s312_s25 }
  0x16   : > { %s128_s30 = sshll.u32 %s121_s29, 4  ;;  %p593_p13 = pnand %p341_p10, %p558_p5  ;;  %s597_s30 = int_to_ptr.vmem [resolvable:$true] %s128_s30 }
  0x17   : > { %s118_s4 = scalar_lea.sflag [#allocation3], %s578_s23  ;;  %s375_s5 = scalar_lea.hbm %s587_s28, 128 }
  0x18   : > { %p376_p2 = scmp.ne.s32.totalorder %s587_s28, %s375_s5  ;;  %p377_p3 = pneg %p593_p13 }
  0x19   : > { %s380_s8 = scalar_lea.hbm %s713_s0, 256  ;;  %p381_p5 = scmp.lt.s32.totalorder %s587_s28, %s713_s0 }
  0x1a   : > { %p378_p4 = pnand %p377_p3, %p376_p2  ;;  %p382_p8 = scmp.lt.s32.totalorder %s380_s8, %s375_s5 }
  0x1c   : > { %p379_p7 = pneg %p378_p4  ;;  %p383_p10 = por %p382_p8, %p381_p5 }
  0x1e   : > { %p384_p9 = pnand %p383_p10, %p379_p7 }
  0x20   : > { %387 = shalt.err (!%p384_p9)
}
  0x21   : > { %s388_s17 = scalar_lea.vmem %s597_s30, 128  ;;  %s501_s19 = smov [#allocation2]  }
  0x22   : > { %p389_p0 = scmp.ne.s32.totalorder %s597_s30, %s388_s17  ;;  %s393_s26 = sshll.u32 %s501_s19, 4  ;;  %s394_s26 = int_to_ptr.vmem [resolvable:$false] %s393_s26 }
  0x23   : > { %s395_s27 = scalar_lea.vmem %s394_s26, 256  ;;  %p396_p1 = scmp.lt.s32.totalorder %s597_s30, %s394_s26 }
  0x24   : > { %p391_p2 = pnand %p389_p0, %p377_p3  ;;  %p397_p12 = scmp.lt.s32.totalorder %s395_s27, %s388_s17 }
  0x26   : > { %p392_p4 = pneg %p391_p2  ;;  %p398_p11 = por %p397_p12, %p396_p1 }
  0x28   : > { %p399_p5 = pnand %p398_p11, %p392_p4 }
  0x2a   : > { %402 = shalt.err (!%p399_p5)
}
  0x2b   : > { %333 = dma.hbm_to_vmem [thread:$0]  (!%p593_p13), %s587_s28, 128, %s597_s30, %s118_s4  }
  0x2c   : > { %p723_p9 = scmp.lt.s32.totalorder %s499_s12, 3  ;;  %p724_p0 = scmp.ge.s32.totalorder %s499_s12, 1 }
  0x2d   : > { %s639_s7 = scalar_lea.hbm %s714_s1, %s313_s24  ;;  %s139_s8 = scalar_lea.vmem [#allocation5], %s312_s25 }
  0x2e   : > { %p630_p7 = pnand %p724_p0, %p723_p9  ;;  %s146_s14 = sshll.u32 %s139_s8, 4  ;;  %s147_s14 = int_to_ptr.vmem [resolvable:$true] %s146_s14 }
  0x2f   : > { %s136_s28 = scalar_lea.sflag [#allocation6], %s578_s23  ;;  %s403_s30 = scalar_lea.hbm %s639_s7, 128 }
  0x30   : > { %s725_s29 = scalar_select %p630_p7, 1, 0 }
  0x31   : > { %p404_p11 = scmp.ne.s32.totalorder %s639_s7, %s403_s30  ;;  %s408_s17 = scalar_lea.hbm %s714_s1, 256 }
  0x32   : > { %p409_p8 = scmp.lt.s32.totalorder %s639_s7, %s714_s1  ;;  %p410_p10 = scmp.lt.s32.totalorder %s408_s17, %s403_s30 }
  0x33   : > { %p406_p12 = pnand %p404_p11, %p377_p3 }
  0x34   : > { %p411_p2 = por %p410_p10, %p409_p8 }
  0x35   : > { %p407_p1 = pneg %p406_p12 }
  0x37   : > { %p412_p4 = pnand %p411_p2, %p407_p1 }
  0x39   : > { %415 = shalt.err (!%p412_p4)
}
  0x3a   : > { %s416_s25 = scalar_lea.vmem %s147_s14, 128  ;;  %s502_s23 = smov [#allocation5]  }
  0x3b   : > { %p417_p5 = scmp.ne.s32.totalorder %s147_s14, %s416_s25  ;;  %s421_s26 = sshll.u32 %s502_s23, 4  ;;  %s422_s26 = int_to_ptr.vmem [resolvable:$false] %s421_s26 }
  0x3c   : > { %s423_s27 = scalar_lea.vmem %s422_s26, 256  ;;  %p424_p11 = scmp.lt.s32.totalorder %s147_s14, %s422_s26 }
  0x3d   : > { %p419_p9 = pnand %p417_p5, %p377_p3  ;;  %p425_p12 = scmp.lt.s32.totalorder %s423_s27, %s416_s25 }
  0x3f   : > { %p420_p0 = pneg %p419_p9  ;;  %p426_p6 = por %p425_p12, %p424_p11 }
  0x41   : > { %p427_p7 = pnand %p426_p6, %p420_p0 }
  0x43   : > { %430 = shalt.err (!%p427_p7)
}
  0x44   : > { %336 = dma.hbm_to_vmem [thread:$0]  (!%p593_p13), %s639_s7, 128, %s147_s14, %s136_s28  }
  0x45   : > { %p726_p1 = scmp.ne.s32.totalorder %s725_s29, 0 }
  0x46   : > { %s665_s5 = sand.u32 (!%p726_p1), 1, %s491_s10   ;;  %p727_p3 = scmp.ne.s32.totalorder (!%p726_p1), %s719_s20, 0 }
  0x47   : > { %155 = sbr.rel (%p726_p1) target bundleno = 104 (0x68), region = 28  ;;  %s317_s6 = sshll.u32 (!%p726_p1), %s665_s5, 3 }
  0x48   : > { %s158_s8 = scalar_lea.sflag (!%p726_p1), [#allocation3], %s665_s5  ;;  %s161_s30 = scalar_lea.vmem (!%p726_p1), [#allocation2], %s317_s6 }
  0x4c   : > { %474 = dma.done.wait (%p727_p3), %s158_s8, 128  }
  0x4d   : > { %476 = vsyncadd (%p727_p3), %s158_s8, 4294967168  ;;  %s167_s3 = scalar_lea.sflag [#allocation6], %s665_s5  ;;  %s170_s7 = scalar_lea.vmem [#allocation5], %s317_s6 }
  0x4e   : > { %478 = dma.done.wait (%p727_p3), %s167_s3, 128  }
  0x4f   : > { %480 = vsyncadd (%p727_p3), %s167_s3, 4294967168  ;;  %v197_v0 = vld [vmem:[%s170_s7] sm:$0xff]  ;;  %v196_v2 = vld [vmem:[%s161_s30] sm:$0xff]  ;;  %s195_s29 = scalar_lea.vmem [#allocation7], %s317_s6  ;;  %s321_s28 = sshll.u32 %s540_s13, 7 }
  0x50   : > { %v198_v1 = vmul.f32 0.1, %v197_v0  ;;  %s216_s14 = sshll.u32 %s195_s29, 4  ;;  %s214_s17 = scalar_lea.hbm %s715_s2, %s321_s28  ;;  %s217_s14 = int_to_ptr.vmem [resolvable:$true] %s216_s14 }
  0x51   : > { %s203_s24 = scalar_lea.sflag [#allocation4], %s665_s5  ;;  %s431_s20 = scalar_lea.vmem %s217_s14, 128 }
  0x52   : > { %v199_v3 = vadd.f32 1.0, %v198_v1  ;;  %p432_p6 = scmp.ne.s32.totalorder %s217_s14, %s431_s20  ;;  %p728_p13 = scmp.ne.s32.totalorder %s720_s21, 0 }
  0x53   : > { %s503_s19 = smov [#allocation7]  }
  0x54   : > { %v200_v4 = vmul.f32 %v199_v3, %v196_v2  ;;  %p433_p7 = pnand %p432_p6, %p728_p13  ;;  %s435_s25 = sshll.u32 %s503_s19, 4  ;;  %s436_s25 = int_to_ptr.vmem [resolvable:$false] %s435_s25 }
  0x55   : > { %s437_s23 = scalar_lea.vmem %s436_s25, 256  ;;  %p438_p10 = scmp.lt.s32.totalorder %s217_s14, %s436_s25 }
  0x56   : > { %201 = vst [vmem:[%s195_s29] sm:$0xff] %v200_v4  ;;  %p434_p8 = pneg %p433_p7  ;;  %p439_p2 = scmp.lt.s32.totalorder %s437_s23, %s431_s20 }
  0x58   : > { %p440_p4 = por %p439_p2, %p438_p10 }
  0x5a   : > { %p441_p5 = pnand %p440_p4, %p434_p8 }
  0x5c   : > { %444 = shalt.err (!%p441_p5)
}
  0x5d   : > { %s445_s13 = scalar_lea.hbm %s214_s17, 128  ;;  %s449_s5 = scalar_lea.hbm %s715_s2, 256 }
  0x5e   : > { %p446_p9 = scmp.ne.s32.totalorder %s214_s17, %s445_s13  ;;  %p450_p12 = scmp.lt.s32.totalorder %s214_s17, %s715_s2 }
  0x5f   : > { %p451_p1 = scmp.lt.s32.totalorder %s449_s5, %s445_s13 }
  0x60   : > { %p447_p0 = pnand %p446_p9, %p728_p13 }
  0x61   : > { %p452_p3 = por %p451_p1, %p450_p12 }
  0x62   : > { %p448_p11 = pneg %p447_p0 }
  0x64   : > { %p453_p6 = pnand %p452_p3, %p448_p11 }
  0x66   : > { %456 = shalt.err (!%p453_p6)
}
  0x67   : > { %328 = dma.vmem_to_hbm [thread:$0]  (%p728_p13), %s217_s14, 128, %s214_s17, %s203_s24  }
  0x68 PF: > { %s228_s30 = sand.u32 1, %s487_s9   ;;  %p729_p7 = scmp.ne.s32.totalorder %s721_s22, 0 }
  0x69   : > { %p730_p8 = scmp.ge.s32.totalorder %s499_s12, 2  ;;  %s229_s3 = scalar_lea.sflag [#allocation4], %s228_s30 }
  0x6b   : > { %p338_p10 = pnand %p730_p8, %p729_p7 }
  0x6d   : > { %p339_p2 = pneg %p338_p10 }
  0x6f   : > { %482 = dma.done.wait (%p339_p2), %s229_s3, 128  }
  0x70   : > { %484 = vsyncadd (%p339_p2), %s229_s3, 4294967168  ;;  %p18_p4 = scmp.ge.s32.totalorder %s544_s15, 4   ;;  %s731_s9 = smov %s491_s10 }
  0x71   : > { %s732_s10 = smov %s495_s11  ;;  %s733_s11 = smov %s556_s18 }
  0x72   : > { %s734_s12 = smov %s544_s15  ;;  %20 = sbr.rel (!%p18_p4) target bundleno = 7 (0x7), region = 86 }
  0x77   :  { %234 = vsyncpa [#allocation3], 1 }
  0x78   :  { %236 = vsyncpa [#allocation3 + $0x1], 1 }
  0x79   :  { %237 = vsyncpa [#allocation6], 1 }
  0x7a   :  { %239 = vsyncpa [#allocation6 + $0x1], 1 }
  0x7b   :  { %240 = vsyncpa [#allocation4], 1 }
  0x7c   :  { %242 = vsyncpa [#allocation4 + $0x1], 1 }

</bundles_post_ra>
